<compile_context>
chip_gen: v7x
topology: tpu7x:2x2x1
jax: 0.10.0
libtpu: 0.0.40
codegen_flags: <defaults>
</compile_context>

<pallas_src>
import jax
import jax.numpy as jnp
from jax import lax
from jax.experimental import pallas as pl
from jax.experimental.pallas import tpu as pltpu

EPS = 1e-5  # PyTorch BatchNorm2d default eps

try:
    _ON_TPU = jax.default_backend() == "tpu"
except Exception:  # pragma: no cover
    _ON_TPU = False


# ----------------------------------------------------------------------------
# Fused ffconv -> (+x) -> rrconv -> (+x) -> rrconv -> 2x2-max kernel (per image)
# ----------------------------------------------------------------------------
def _make_rcl_kernel(H, W, C):
    """Kernel operating on one image in lane-dense layout.

    x block : (C, H*W)   channels on sublanes, flat (h, w) on lanes
    output  : (C, H*W)   4-tap max (pool values live at even (h, w) lanes)
    """
    HW = H * W
    # tap order (di, dj) row-major over (-1, 0, 1) == (kh, kw) of an HWIO kernel
    OFFS = tuple(di * W + dj for di in (-1, 0, 1) for dj in (-1, 0, 1))

    def lane_shift(z, off):
        # tap[c, p] = z[c, (p + off) mod HW].  Wrapped lanes are either zeroed by
        # the precomputed edge masks (3x3 taps) or land on lanes the pool
        # subsample never reads -- do NOT drop the masks if this is changed.
        if off == 0:
            return z
        s = (-off) % HW
        if _ON_TPU:
            return pltpu.roll(z, shift=s, axis=1)   # XLU rotate: no pad, no copy
        return jnp.roll(z, s, axis=1)               # interpret/CPU fallback

    def kernel(x_ref, w1_ref, t1_ref, w3_ref, t3_ref, mask_ref, o_ref, stack_ref):
        x = x_ref[...]                 # (C, HW) f32 -- one image
        w1 = w1_ref[...]               # (C, C)   BN-scale already folded in
        w3 = w3_ref[...]               # (C, 9C)  BN-scale already folded in
        masks = mask_ref[...]          # (9, HW)  0/1 edge masks (host-precomputed)
        # hoisted: rrconv is traced twice and JAX does not CSE broadcast_in_dim
        t3b = jnp.broadcast_to(t3_ref[...], (C, HW))

        # ---- ffconv: 1x1 conv == channel matmul, + folded-BN shift, ReLU ------
        y = jnp.maximum(
            jnp.dot(w1, x, preferred_element_type=jnp.float32) + t1_ref[...], 0.0)

        # ---- rrconv: 3x3 SAME conv + folded BN + ReLU (applied twice) ---------
        def rrconv(z):
            # stage the 9 masked taps into a VMEM scratch row-band by row-band so
            # at most one (C, HW) tap is live in vregs, then ONE K=9C MXU dot.
            for i, off in enumerate(OFFS):
                tap = lane_shift(z, off)
                if i != 4:                               # centre tap needs no mask
                    tap = tap * masks[i:i + 1, :]
                stack_ref[pl.ds(i * C, C), :] = tap
            v = jnp.dot(w3, stack_ref[...], preferred_element_type=jnp.float32)
            return jnp.maximum(v + t3b, 0.0)

        y = rrconv(x + y)          # same weights applied twice (recurrent block)
        y = rrconv(x + y)

        # ---- fused 2x2 max (pool compute).  The stride-2 subsample is pure
        # layout and happens in the wrapper's reshape/transpose; the +1/+W/+W+1
        # taps never wrap at the even (h, w) lanes that are actually selected.
        m = jnp.maximum(jnp.maximum(y, lane_shift(y, 1)),
                        jnp.maximum(lane_shift(y, W), lane_shift(y, W + 1)))
        o_ref[...] = m                                  # lane-dense (C, HW) store

    return kernel


def _compiler_params():
    # "parallel" over the image axis: lets v7x's two TensorCores take different
    # images; harmless elsewhere (ignored in interpret mode).
    return pltpu.CompilerParams(dimension_semantics=("parallel",))


# ----------------------------------------------------------------------------
# Wrapper (NHWC interface; layout plumbing and BN folding done here)
# ----------------------------------------------------------------------------
@jax.jit
def rcl_block_forward(x_nhwc, p):
    N, H, W, C = x_nhwc.shape
    HW = H * W

    # lane-dense kernel layout: channels on sublanes, flat (n, h, w) on lanes
    x_t = x_nhwc.transpose(3, 0, 1, 2).reshape(C, N * HW).astype(jnp.float32)

    # fold conv bias + eval-mode BN scale into the weights; keep only the shifts
    w1t = (p["s1"][:, None] * p["w1"].T).astype(jnp.float32)                  # (C, C)
    w3t = (p["s3"][:, None] * p["w3"].reshape(9 * C, C).T).astype(jnp.float32)  # (C, 9C)
    t1 = p["t1"].reshape(C, 1).astype(jnp.float32)
    t3 = p["t3"].reshape(C, 1).astype(jnp.float32)

    # 3x3 edge masks, precomputed host-side (constant-folded under jit).  Row
    # order matches the kernel's tap order: (di, dj) row-major over (-1, 0, 1).
    hh = jnp.arange(HW, dtype=jnp.int32) // W
    ww = jnp.arange(HW, dtype=jnp.int32) % W
    rows = []
    for di in (-1, 0, 1):
        for dj in (-1, 0, 1):
            mh = jnp.ones((HW,), jnp.bool_) if di == 0 else (hh > 0 if di < 0 else hh < H - 1)
            mw = jnp.ones((HW,), jnp.bool_) if dj == 0 else (ww > 0 if dj < 0 else ww < W - 1)
            rows.append((mh & mw).astype(jnp.float32))
    masks = jnp.stack(rows, axis=0)                                           # (9, HW)

    kernel = _make_rcl_kernel(H, W, C)

    out = pl.pallas_call(
        kernel,
        out_shape=jax.ShapeDtypeStruct((C, N * HW), jnp.float32),
        grid=(N,),                                         # one image per step
        in_specs=[
            pl.BlockSpec((C, HW), lambda n: (0, n)),       # x  (per image)
            pl.BlockSpec((C, C), lambda n: (0, 0)),        # w1t (resident)
            pl.BlockSpec((C, 1), lambda n: (0, 0)),        # t1
            pl.BlockSpec((C, 9 * C), lambda n: (0, 0)),    # w3t
            pl.BlockSpec((C, 1), lambda n: (0, 0)),        # t3
            pl.BlockSpec((9, HW), lambda n: (0, 0)),       # masks (resident)
        ],
        out_specs=pl.BlockSpec((C, HW), lambda n: (0, n)),
        scratch_shapes=[pltpu.VMEM((9 * C, HW), jnp.float32)],   # 9-tap stack
        compiler_params=_compiler_params(),
    )(x_t, w1t, t1, w3t, t3, masks)

    # MaxPool2d(2, 2) subsample (the max itself was computed in-kernel); Dropout
    # is identity in eval mode.  Pure layout, fused by XLA with the transpose.
    out = out.reshape(C, N, H, W)[:, :, ::2, ::2]
    return out.transpose(1, 2, 3, 0)                       # -> NHWC (N, Ho, Wo, C)


# ----------------------------------------------------------------------------
# Deterministic parameter init (inplanes == planes == C, required by x + y)
# ----------------------------------------------------------------------------
def init_params(key, C):
    ks = jax.random.split(key, 12)
    p = {}
    # ffconv: Conv2d 1x1 (stored (Cin, Cout)) + BN
    p["w1"] = jax.random.normal(ks[0], (C, C), jnp.float32) / jnp.sqrt(C)
    p["b1"] = 0.1 * jax.random.normal(ks[1], (C,), jnp.float32)
    p["g1"] = 1.0 + 0.2 * jax.random.normal(ks[2], (C,), jnp.float32)
    p["be1"] = 0.1 * jax.random.normal(ks[3], (C,), jnp.float32)
    p["m1"] = 0.1 * jax.random.normal(ks[4], (C,), jnp.float32)
    p["v1"] = 1.0 + 0.2 * jax.random.uniform(ks[5], (C,), jnp.float32)
    # rrconv: Conv2d 3x3 (stored HWIO: (3, 3, Cin, Cout)) + BN
    p["w3"] = jax.random.normal(ks[6], (3, 3, C, C), jnp.float32) / jnp.sqrt(9 * C)
    p["b3"] = 0.1 * jax.random.normal(ks[7], (C,), jnp.float32)
    p["g3"] = 1.0 + 0.2 * jax.random.normal(ks[8], (C,), jnp.float32)
    p["be3"] = 0.1 * jax.random.normal(ks[9], (C,), jnp.float32)
    p["m3"] = 0.1 * jax.random.normal(ks[10], (C,), jnp.float32)
    p["v3"] = 1.0 + 0.2 * jax.random.uniform(ks[11], (C,), jnp.float32)
    # fold conv-bias + eval-mode BN into per-channel scale / shift
    s1 = p["g1"] / jnp.sqrt(p["v1"] + EPS)
    s3 = p["g3"] / jnp.sqrt(p["v3"] + EPS)
    p["s1"] = s1
    p["t1"] = p["be1"] + s1 * (p["b1"] - p["m1"])
    p["s3"] = s3
    p["t3"] = p["be3"] + s3 * (p["b3"] - p["m3"])
    return p


# ----------------------------------------------------------------------------
# Pure-JAX reference (NHWC, eval-mode BN, Dropout = identity), full f32
# ----------------------------------------------------------------------------
def ref_forward(x, p):
    def bn_relu(v, g, be, m, var):
        return jnp.maximum((v - m) / jnp.sqrt(var + EPS) * g + be, 0.0)

    def ffconv(z):
        v = jnp.einsum("nhwc,cd->nhwd", z, p["w1"],
                       precision=lax.Precision.HIGHEST) + p["b1"]
        return bn_relu(v, p["g1"], p["be1"], p["m1"], p["v1"])

    def rrconv(z):
        v = lax.conv_general_dilated(
            z, p["w3"], window_strides=(1, 1), padding="SAME",
            dimension_numbers=("NHWC", "HWIO", "NHWC"),
            precision=lax.Precision.HIGHEST) + p["b3"]
        return bn_relu(v, p["g3"], p["be3"], p["m3"], p["v3"])

    y = ffconv(x)
    y = rrconv(x + y)
    y = rrconv(x + y)
    return lax.reduce_window(y, -jnp.inf, lax.max,
                             (1, 2, 2, 1), (1, 2, 2, 1), "VALID")


if __name__ == "__main__":
    N, C, H, W = 2, 8, 16, 16            # inplanes == planes (needed for x + y)
    key = jax.random.PRNGKey(0)
    kx, kp = jax.random.split(key)

    x_nchw = jax.random.normal(kx, (N, C, H, W), jnp.float32)   # PyTorch layout
    x_nhwc = jnp.transpose(x_nchw, (0, 2, 3, 1))                # kernel layout
    params = init_params(kp, C)

    out = rcl_block_forward(x_nhwc, params)
    out = jax.block_until_ready(out)
    assert out.shape == (N, H // 2, W // 2, C), out.shape

    ref = ref_forward(x_nhwc, params)
    err = float(jnp.max(jnp.abs(out - ref)))
    scale = float(jnp.max(jnp.abs(ref)))
    # kernel dots are f32-in / f32-acc; on TPU hardware the default-precision MXU
    # path may truncate operands to bf16, so allow ~1-2% relative error.  Real
    # bugs (wrong tap offsets, masks, BN folding, pool indices) give O(0.3+).
    assert err <= 0.02 * scale + 0.02, f"max abs err {err} (ref max {scale})"

    print("KERNEL_OK")
</pallas_src>

<mosaic_0001>
module attributes {stable_mosaic.version = 11 : i64} {
  func.func @kernel(%arg0: i32, %arg1: memref<8x256xf32, #tpu.memory_space<vmem>>, %arg2: memref<8x8xf32, #tpu.memory_space<vmem>>, %arg3: memref<8x1xf32, #tpu.memory_space<vmem>>, %arg4: memref<8x72xf32, #tpu.memory_space<vmem>>, %arg5: memref<8x1xf32, #tpu.memory_space<vmem>>, %arg6: memref<9x256xf32, #tpu.memory_space<vmem>>, %arg7: memref<8x256xf32, #tpu.memory_space<vmem>>, %arg8: memref<72x256xf32, #tpu.memory_space<vmem>>) attributes {dimension_semantics = [#tpu.dimension_semantics<parallel>], iteration_bounds = array<i64: 2>, scalar_prefetch = 0 : i64, scratch_operands = 1 : i64, tpu.core_type = #tpu.core_type<tc>, window_params = [{transform_indices = @transform_0, window_bounds = array<i64: 8, 256>}, {pipeline_mode = #tpu.pipeline_mode<synchronous>, transform_indices = @transform_1, window_bounds = array<i64: 8, 8>}, {pipeline_mode = #tpu.pipeline_mode<synchronous>, transform_indices = @transform_2, window_bounds = array<i64: 8, 1>}, {pipeline_mode = #tpu.pipeline_mode<synchronous>, transform_indices = @transform_3, window_bounds = array<i64: 8, 72>}, {pipeline_mode = #tpu.pipeline_mode<synchronous>, transform_indices = @transform_4, window_bounds = array<i64: 8, 1>}, {pipeline_mode = #tpu.pipeline_mode<synchronous>, transform_indices = @transform_5, window_bounds = array<i64: 9, 256>}, {transform_indices = @transform_6, window_bounds = array<i64: 8, 256>}]} {
    %c0 = arith.constant 0 : index
    %c0_0 = arith.constant 0 : index
    %0 = vector.load %arg1[%c0, %c0_0] : memref<8x256xf32, #tpu.memory_space<vmem>>, vector<8x256xf32>
    %c0_1 = arith.constant 0 : index
    %c0_2 = arith.constant 0 : index
    %1 = vector.load %arg2[%c0_1, %c0_2] : memref<8x8xf32, #tpu.memory_space<vmem>>, vector<8x8xf32>
    %c0_3 = arith.constant 0 : index
    %c0_4 = arith.constant 0 : index
    %2 = vector.load %arg4[%c0_3, %c0_4] : memref<8x72xf32, #tpu.memory_space<vmem>>, vector<8x72xf32>
    %c0_5 = arith.constant 0 : index
    %c0_6 = arith.constant 0 : index
    %3 = vector.load %arg6[%c0_5, %c0_6] : memref<9x256xf32, #tpu.memory_space<vmem>>, vector<9x256xf32>
    %c0_7 = arith.constant 0 : index
    %c0_8 = arith.constant 0 : index
    %4 = vector.load %arg5[%c0_7, %c0_8] : memref<8x1xf32, #tpu.memory_space<vmem>>, vector<8x1xf32>
    %5 = vector.shape_cast %4 : vector<8x1xf32> to vector<8x1xf32>
    %6 = vector.broadcast %5 : vector<8x1xf32> to vector<8x256xf32>
    %cst = arith.constant dense<0.000000e+00> : vector<8x256xf32>
    %7 = tpu.matmul %1, %0, %cst {dimension_numbers = #tpu.dot_dimension_numbers<[1], [0], [0], [1], [0, 0, 1, 1], [], []>} : vector<8x8xf32>, vector<8x256xf32>, vector<8x256xf32> -> vector<8x256xf32>
    %c0_9 = arith.constant 0 : index
    %c0_10 = arith.constant 0 : index
    %8 = vector.load %arg3[%c0_9, %c0_10] : memref<8x1xf32, #tpu.memory_space<vmem>>, vector<8x1xf32>
    %9 = vector.broadcast %8 : vector<8x1xf32> to vector<8x256xf32>
    %10 = arith.addf %7, %9 : vector<8x256xf32>
    %cst_11 = arith.constant 0.000000e+00 : f32
    %11 = vector.broadcast %cst_11 : f32 to vector<8x256xf32>
    %12 = arith.maximumf %10, %11 : vector<8x256xf32>
    %13 = arith.addf %0, %12 : vector<8x256xf32>
    %14 = vector.extract_strided_slice %13 {offsets = [0, 239], sizes = [8, 17], strides = [1, 1]} : vector<8x256xf32> to vector<8x17xf32>
    %15 = vector.extract_strided_slice %13 {offsets = [0, 0], sizes = [8, 239], strides = [1, 1]} : vector<8x256xf32> to vector<8x239xf32>
    %16 = tpu.concatenate %14, %15 in 1 : vector<8x17xf32>, vector<8x239xf32> -> vector<8x256xf32>
    %17 = vector.extract_strided_slice %3 {offsets = [0, 0], sizes = [1, 256], strides = [1, 1]} : vector<9x256xf32> to vector<1x256xf32>
    %18 = vector.broadcast %17 : vector<1x256xf32> to vector<8x256xf32>
    %19 = arith.mulf %16, %18 : vector<8x256xf32>
    %c0_12 = arith.constant 0 : index
    %c0_13 = arith.constant 0 : index
    %20 = vector.load %arg8[%c0_12, %c0_13] : memref<72x256xf32, #tpu.memory_space<vmem>>, vector<8x256xf32>
    tpu.vector_store %arg8[%c0_12, %c0_13], %19 {strides = array<i32>} : memref<72x256xf32, #tpu.memory_space<vmem>>, vector<8x256xf32>,
    %21 = vector.extract_strided_slice %13 {offsets = [0, 240], sizes = [8, 16], strides = [1, 1]} : vector<8x256xf32> to vector<8x16xf32>
    %22 = vector.extract_strided_slice %13 {offsets = [0, 0], sizes = [8, 240], strides = [1, 1]} : vector<8x256xf32> to vector<8x240xf32>
    %23 = tpu.concatenate %21, %22 in 1 : vector<8x16xf32>, vector<8x240xf32> -> vector<8x256xf32>
    %24 = vector.extract_strided_slice %3 {offsets = [1, 0], sizes = [1, 256], strides = [1, 1]} : vector<9x256xf32> to vector<1x256xf32>
    %25 = vector.broadcast %24 : vector<1x256xf32> to vector<8x256xf32>
    %26 = arith.mulf %23, %25 : vector<8x256xf32>
    %c8 = arith.constant 8 : index
    %c0_14 = arith.constant 0 : index
    %27 = vector.load %arg8[%c8, %c0_14] : memref<72x256xf32, #tpu.memory_space<vmem>>, vector<8x256xf32>
    tpu.vector_store %arg8[%c8, %c0_14], %26 {strides = array<i32>} : memref<72x256xf32, #tpu.memory_space<vmem>>, vector<8x256xf32>,
    %28 = vector.extract_strided_slice %13 {offsets = [0, 241], sizes = [8, 15], strides = [1, 1]} : vector<8x256xf32> to vector<8x15xf32>
    %29 = vector.extract_strided_slice %13 {offsets = [0, 0], sizes = [8, 241], strides = [1, 1]} : vector<8x256xf32> to vector<8x241xf32>
    %30 = tpu.concatenate %28, %29 in 1 : vector<8x15xf32>, vector<8x241xf32> -> vector<8x256xf32>
    %31 = vector.extract_strided_slice %3 {offsets = [2, 0], sizes = [1, 256], strides = [1, 1]} : vector<9x256xf32> to vector<1x256xf32>
    %32 = vector.broadcast %31 : vector<1x256xf32> to vector<8x256xf32>
    %33 = arith.mulf %30, %32 : vector<8x256xf32>
    %c16 = arith.constant 16 : index
    %c0_15 = arith.constant 0 : index
    %34 = vector.load %arg8[%c16, %c0_15] : memref<72x256xf32, #tpu.memory_space<vmem>>, vector<8x256xf32>
    tpu.vector_store %arg8[%c16, %c0_15], %33 {strides = array<i32>} : memref<72x256xf32, #tpu.memory_space<vmem>>, vector<8x256xf32>,
    %35 = vector.extract_strided_slice %13 {offsets = [0, 255], sizes = [8, 1], strides = [1, 1]} : vector<8x256xf32> to vector<8x1xf32>
    %36 = vector.extract_strided_slice %13 {offsets = [0, 0], sizes = [8, 255], strides = [1, 1]} : vector<8x256xf32> to vector<8x255xf32>
    %37 = tpu.concatenate %35, %36 in 1 : vector<8x1xf32>, vector<8x255xf32> -> vector<8x256xf32>
    %38 = vector.extract_strided_slice %3 {offsets = [3, 0], sizes = [1, 256], strides = [1, 1]} : vector<9x256xf32> to vector<1x256xf32>
    %39 = vector.broadcast %38 : vector<1x256xf32> to vector<8x256xf32>
    %40 = arith.mulf %37, %39 : vector<8x256xf32>
    %c24 = arith.constant 24 : index
    %c0_16 = arith.constant 0 : index
    %41 = vector.load %arg8[%c24, %c0_16] : memref<72x256xf32, #tpu.memory_space<vmem>>, vector<8x256xf32>
    tpu.vector_store %arg8[%c24, %c0_16], %40 {strides = array<i32>} : memref<72x256xf32, #tpu.memory_space<vmem>>, vector<8x256xf32>,
    %c32 = arith.constant 32 : index
    %c0_17 = arith.constant 0 : index
    %42 = vector.load %arg8[%c32, %c0_17] : memref<72x256xf32, #tpu.memory_space<vmem>>, vector<8x256xf32>
    tpu.vector_store %arg8[%c32, %c0_17], %13 {strides = array<i32>} : memref<72x256xf32, #tpu.memory_space<vmem>>, vector<8x256xf32>,
    %43 = vector.extract_strided_slice %13 {offsets = [0, 1], sizes = [8, 255], strides = [1, 1]} : vector<8x256xf32> to vector<8x255xf32>
    %44 = vector.extract_strided_slice %13 {offsets = [0, 0], sizes = [8, 1], strides = [1, 1]} : vector<8x256xf32> to vector<8x1xf32>
    %45 = tpu.concatenate %43, %44 in 1 : vector<8x255xf32>, vector<8x1xf32> -> vector<8x256xf32>
    %46 = vector.extract_strided_slice %3 {offsets = [5, 0], sizes = [1, 256], strides = [1, 1]} : vector<9x256xf32> to vector<1x256xf32>
    %47 = vector.broadcast %46 : vector<1x256xf32> to vector<8x256xf32>
    %48 = arith.mulf %45, %47 : vector<8x256xf32>
    %c40 = arith.constant 40 : index
    %c0_18 = arith.constant 0 : index
    %49 = vector.load %arg8[%c40, %c0_18] : memref<72x256xf32, #tpu.memory_space<vmem>>, vector<8x256xf32>
    tpu.vector_store %arg8[%c40, %c0_18], %48 {strides = array<i32>} : memref<72x256xf32, #tpu.memory_space<vmem>>, vector<8x256xf32>,
    %50 = vector.extract_strided_slice %13 {offsets = [0, 15], sizes = [8, 241], strides = [1, 1]} : vector<8x256xf32> to vector<8x241xf32>
    %51 = vector.extract_strided_slice %13 {offsets = [0, 0], sizes = [8, 15], strides = [1, 1]} : vector<8x256xf32> to vector<8x15xf32>
    %52 = tpu.concatenate %50, %51 in 1 : vector<8x241xf32>, vector<8x15xf32> -> vector<8x256xf32>
    %53 = vector.extract_strided_slice %3 {offsets = [6, 0], sizes = [1, 256], strides = [1, 1]} : vector<9x256xf32> to vector<1x256xf32>
    %54 = vector.broadcast %53 : vector<1x256xf32> to vector<8x256xf32>
    %55 = arith.mulf %52, %54 : vector<8x256xf32>
    %c48 = arith.constant 48 : index
    %c0_19 = arith.constant 0 : index
    %56 = vector.load %arg8[%c48, %c0_19] : memref<72x256xf32, #tpu.memory_space<vmem>>, vector<8x256xf32>
    tpu.vector_store %arg8[%c48, %c0_19], %55 {strides = array<i32>} : memref<72x256xf32, #tpu.memory_space<vmem>>, vector<8x256xf32>,
    %57 = vector.extract_strided_slice %13 {offsets = [0, 16], sizes = [8, 240], strides = [1, 1]} : vector<8x256xf32> to vector<8x240xf32>
    %58 = vector.extract_strided_slice %13 {offsets = [0, 0], sizes = [8, 16], strides = [1, 1]} : vector<8x256xf32> to vector<8x16xf32>
    %59 = tpu.concatenate %57, %58 in 1 : vector<8x240xf32>, vector<8x16xf32> -> vector<8x256xf32>
    %60 = vector.extract_strided_slice %3 {offsets = [7, 0], sizes = [1, 256], strides = [1, 1]} : vector<9x256xf32> to vector<1x256xf32>
    %61 = vector.broadcast %60 : vector<1x256xf32> to vector<8x256xf32>
    %62 = arith.mulf %59, %61 : vector<8x256xf32>
    %c56 = arith.constant 56 : index
    %c0_20 = arith.constant 0 : index
    %63 = vector.load %arg8[%c56, %c0_20] : memref<72x256xf32, #tpu.memory_space<vmem>>, vector<8x256xf32>
    tpu.vector_store %arg8[%c56, %c0_20], %62 {strides = array<i32>} : memref<72x256xf32, #tpu.memory_space<vmem>>, vector<8x256xf32>,
    %64 = vector.extract_strided_slice %13 {offsets = [0, 17], sizes = [8, 239], strides = [1, 1]} : vector<8x256xf32> to vector<8x239xf32>
    %65 = vector.extract_strided_slice %13 {offsets = [0, 0], sizes = [8, 17], strides = [1, 1]} : vector<8x256xf32> to vector<8x17xf32>
    %66 = tpu.concatenate %64, %65 in 1 : vector<8x239xf32>, vector<8x17xf32> -> vector<8x256xf32>
    %67 = vector.extract_strided_slice %3 {offsets = [8, 0], sizes = [1, 256], strides = [1, 1]} : vector<9x256xf32> to vector<1x256xf32>
    %68 = vector.broadcast %67 : vector<1x256xf32> to vector<8x256xf32>
    %69 = arith.mulf %66, %68 : vector<8x256xf32>
    %c64 = arith.constant 64 : index
    %c0_21 = arith.constant 0 : index
    %70 = vector.load %arg8[%c64, %c0_21] : memref<72x256xf32, #tpu.memory_space<vmem>>, vector<8x256xf32>
    tpu.vector_store %arg8[%c64, %c0_21], %69 {strides = array<i32>} : memref<72x256xf32, #tpu.memory_space<vmem>>, vector<8x256xf32>,
    %c0_22 = arith.constant 0 : index
    %c0_23 = arith.constant 0 : index
    %71 = vector.load %arg8[%c0_22, %c0_23] : memref<72x256xf32, #tpu.memory_space<vmem>>, vector<72x256xf32>
    %cst_24 = arith.constant dense<0.000000e+00> : vector<8x256xf32>
    %72 = tpu.matmul %2, %71, %cst_24 {dimension_numbers = #tpu.dot_dimension_numbers<[1], [0], [0], [1], [0, 0, 1, 1], [], []>} : vector<8x72xf32>, vector<72x256xf32>, vector<8x256xf32> -> vector<8x256xf32>
    %73 = arith.addf %72, %6 : vector<8x256xf32>
    %cst_25 = arith.constant 0.000000e+00 : f32
    %74 = vector.broadcast %cst_25 : f32 to vector<8x256xf32>
    %75 = arith.maximumf %73, %74 : vector<8x256xf32>
    %76 = arith.addf %0, %75 : vector<8x256xf32>
    %77 = vector.extract_strided_slice %76 {offsets = [0, 239], sizes = [8, 17], strides = [1, 1]} : vector<8x256xf32> to vector<8x17xf32>
    %78 = vector.extract_strided_slice %76 {offsets = [0, 0], sizes = [8, 239], strides = [1, 1]} : vector<8x256xf32> to vector<8x239xf32>
    %79 = tpu.concatenate %77, %78 in 1 : vector<8x17xf32>, vector<8x239xf32> -> vector<8x256xf32>
    %80 = vector.extract_strided_slice %3 {offsets = [0, 0], sizes = [1, 256], strides = [1, 1]} : vector<9x256xf32> to vector<1x256xf32>
    %81 = vector.broadcast %80 : vector<1x256xf32> to vector<8x256xf32>
    %82 = arith.mulf %79, %81 : vector<8x256xf32>
    %c0_26 = arith.constant 0 : index
    %c0_27 = arith.constant 0 : index
    %83 = vector.load %arg8[%c0_26, %c0_27] : memref<72x256xf32, #tpu.memory_space<vmem>>, vector<8x256xf32>
    tpu.vector_store %arg8[%c0_26, %c0_27], %82 {strides = array<i32>} : memref<72x256xf32, #tpu.memory_space<vmem>>, vector<8x256xf32>,
    %84 = vector.extract_strided_slice %76 {offsets = [0, 240], sizes = [8, 16], strides = [1, 1]} : vector<8x256xf32> to vector<8x16xf32>
    %85 = vector.extract_strided_slice %76 {offsets = [0, 0], sizes = [8, 240], strides = [1, 1]} : vector<8x256xf32> to vector<8x240xf32>
    %86 = tpu.concatenate %84, %85 in 1 : vector<8x16xf32>, vector<8x240xf32> -> vector<8x256xf32>
    %87 = vector.extract_strided_slice %3 {offsets = [1, 0], sizes = [1, 256], strides = [1, 1]} : vector<9x256xf32> to vector<1x256xf32>
    %88 = vector.broadcast %87 : vector<1x256xf32> to vector<8x256xf32>
    %89 = arith.mulf %86, %88 : vector<8x256xf32>
    %c8_28 = arith.constant 8 : index
    %c0_29 = arith.constant 0 : index
    %90 = vector.load %arg8[%c8_28, %c0_29] : memref<72x256xf32, #tpu.memory_space<vmem>>, vector<8x256xf32>
    tpu.vector_store %arg8[%c8_28, %c0_29], %89 {strides = array<i32>} : memref<72x256xf32, #tpu.memory_space<vmem>>, vector<8x256xf32>,
    %91 = vector.extract_strided_slice %76 {offsets = [0, 241], sizes = [8, 15], strides = [1, 1]} : vector<8x256xf32> to vector<8x15xf32>
    %92 = vector.extract_strided_slice %76 {offsets = [0, 0], sizes = [8, 241], strides = [1, 1]} : vector<8x256xf32> to vector<8x241xf32>
    %93 = tpu.concatenate %91, %92 in 1 : vector<8x15xf32>, vector<8x241xf32> -> vector<8x256xf32>
    %94 = vector.extract_strided_slice %3 {offsets = [2, 0], sizes = [1, 256], strides = [1, 1]} : vector<9x256xf32> to vector<1x256xf32>
    %95 = vector.broadcast %94 : vector<1x256xf32> to vector<8x256xf32>
    %96 = arith.mulf %93, %95 : vector<8x256xf32>
    %c16_30 = arith.constant 16 : index
    %c0_31 = arith.constant 0 : index
    %97 = vector.load %arg8[%c16_30, %c0_31] : memref<72x256xf32, #tpu.memory_space<vmem>>, vector<8x256xf32>
    tpu.vector_store %arg8[%c16_30, %c0_31], %96 {strides = array<i32>} : memref<72x256xf32, #tpu.memory_space<vmem>>, vector<8x256xf32>,
    %98 = vector.extract_strided_slice %76 {offsets = [0, 255], sizes = [8, 1], strides = [1, 1]} : vector<8x256xf32> to vector<8x1xf32>
    %99 = vector.extract_strided_slice %76 {offsets = [0, 0], sizes = [8, 255], strides = [1, 1]} : vector<8x256xf32> to vector<8x255xf32>
    %100 = tpu.concatenate %98, %99 in 1 : vector<8x1xf32>, vector<8x255xf32> -> vector<8x256xf32>
    %101 = vector.extract_strided_slice %3 {offsets = [3, 0], sizes = [1, 256], strides = [1, 1]} : vector<9x256xf32> to vector<1x256xf32>
    %102 = vector.broadcast %101 : vector<1x256xf32> to vector<8x256xf32>
    %103 = arith.mulf %100, %102 : vector<8x256xf32>
    %c24_32 = arith.constant 24 : index
    %c0_33 = arith.constant 0 : index
    %104 = vector.load %arg8[%c24_32, %c0_33] : memref<72x256xf32, #tpu.memory_space<vmem>>, vector<8x256xf32>
    tpu.vector_store %arg8[%c24_32, %c0_33], %103 {strides = array<i32>} : memref<72x256xf32, #tpu.memory_space<vmem>>, vector<8x256xf32>,
    %c32_34 = arith.constant 32 : index
    %c0_35 = arith.constant 0 : index
    %105 = vector.load %arg8[%c32_34, %c0_35] : memref<72x256xf32, #tpu.memory_space<vmem>>, vector<8x256xf32>
    tpu.vector_store %arg8[%c32_34, %c0_35], %76 {strides = array<i32>} : memref<72x256xf32, #tpu.memory_space<vmem>>, vector<8x256xf32>,
    %106 = vector.extract_strided_slice %76 {offsets = [0, 1], sizes = [8, 255], strides = [1, 1]} : vector<8x256xf32> to vector<8x255xf32>
    %107 = vector.extract_strided_slice %76 {offsets = [0, 0], sizes = [8, 1], strides = [1, 1]} : vector<8x256xf32> to vector<8x1xf32>
    %108 = tpu.concatenate %106, %107 in 1 : vector<8x255xf32>, vector<8x1xf32> -> vector<8x256xf32>
    %109 = vector.extract_strided_slice %3 {offsets = [5, 0], sizes = [1, 256], strides = [1, 1]} : vector<9x256xf32> to vector<1x256xf32>
    %110 = vector.broadcast %109 : vector<1x256xf32> to vector<8x256xf32>
    %111 = arith.mulf %108, %110 : vector<8x256xf32>
    %c40_36 = arith.constant 40 : index
    %c0_37 = arith.constant 0 : index
    %112 = vector.load %arg8[%c40_36, %c0_37] : memref<72x256xf32, #tpu.memory_space<vmem>>, vector<8x256xf32>
    tpu.vector_store %arg8[%c40_36, %c0_37], %111 {strides = array<i32>} : memref<72x256xf32, #tpu.memory_space<vmem>>, vector<8x256xf32>,
    %113 = vector.extract_strided_slice %76 {offsets = [0, 15], sizes = [8, 241], strides = [1, 1]} : vector<8x256xf32> to vector<8x241xf32>
    %114 = vector.extract_strided_slice %76 {offsets = [0, 0], sizes = [8, 15], strides = [1, 1]} : vector<8x256xf32> to vector<8x15xf32>
    %115 = tpu.concatenate %113, %114 in 1 : vector<8x241xf32>, vector<8x15xf32> -> vector<8x256xf32>
    %116 = vector.extract_strided_slice %3 {offsets = [6, 0], sizes = [1, 256], strides = [1, 1]} : vector<9x256xf32> to vector<1x256xf32>
    %117 = vector.broadcast %116 : vector<1x256xf32> to vector<8x256xf32>
    %118 = arith.mulf %115, %117 : vector<8x256xf32>
    %c48_38 = arith.constant 48 : index
    %c0_39 = arith.constant 0 : index
    %119 = vector.load %arg8[%c48_38, %c0_39] : memref<72x256xf32, #tpu.memory_space<vmem>>, vector<8x256xf32>
    tpu.vector_store %arg8[%c48_38, %c0_39], %118 {strides = array<i32>} : memref<72x256xf32, #tpu.memory_space<vmem>>, vector<8x256xf32>,
    %120 = vector.extract_strided_slice %76 {offsets = [0, 16], sizes = [8, 240], strides = [1, 1]} : vector<8x256xf32> to vector<8x240xf32>
    %121 = vector.extract_strided_slice %76 {offsets = [0, 0], sizes = [8, 16], strides = [1, 1]} : vector<8x256xf32> to vector<8x16xf32>
    %122 = tpu.concatenate %120, %121 in 1 : vector<8x240xf32>, vector<8x16xf32> -> vector<8x256xf32>
    %123 = vector.extract_strided_slice %3 {offsets = [7, 0], sizes = [1, 256], strides = [1, 1]} : vector<9x256xf32> to vector<1x256xf32>
    %124 = vector.broadcast %123 : vector<1x256xf32> to vector<8x256xf32>
    %125 = arith.mulf %122, %124 : vector<8x256xf32>
    %c56_40 = arith.constant 56 : index
    %c0_41 = arith.constant 0 : index
    %126 = vector.load %arg8[%c56_40, %c0_41] : memref<72x256xf32, #tpu.memory_space<vmem>>, vector<8x256xf32>
    tpu.vector_store %arg8[%c56_40, %c0_41], %125 {strides = array<i32>} : memref<72x256xf32, #tpu.memory_space<vmem>>, vector<8x256xf32>,
    %127 = vector.extract_strided_slice %76 {offsets = [0, 17], sizes = [8, 239], strides = [1, 1]} : vector<8x256xf32> to vector<8x239xf32>
    %128 = vector.extract_strided_slice %76 {offsets = [0, 0], sizes = [8, 17], strides = [1, 1]} : vector<8x256xf32> to vector<8x17xf32>
    %129 = tpu.concatenate %127, %128 in 1 : vector<8x239xf32>, vector<8x17xf32> -> vector<8x256xf32>
    %130 = vector.extract_strided_slice %3 {offsets = [8, 0], sizes = [1, 256], strides = [1, 1]} : vector<9x256xf32> to vector<1x256xf32>
    %131 = vector.broadcast %130 : vector<1x256xf32> to vector<8x256xf32>
    %132 = arith.mulf %129, %131 : vector<8x256xf32>
    %c64_42 = arith.constant 64 : index
    %c0_43 = arith.constant 0 : index
    %133 = vector.load %arg8[%c64_42, %c0_43] : memref<72x256xf32, #tpu.memory_space<vmem>>, vector<8x256xf32>
    tpu.vector_store %arg8[%c64_42, %c0_43], %132 {strides = array<i32>} : memref<72x256xf32, #tpu.memory_space<vmem>>, vector<8x256xf32>,
    %c0_44 = arith.constant 0 : index
    %c0_45 = arith.constant 0 : index
    %134 = vector.load %arg8[%c0_44, %c0_45] : memref<72x256xf32, #tpu.memory_space<vmem>>, vector<72x256xf32>
    %cst_46 = arith.constant dense<0.000000e+00> : vector<8x256xf32>
    %135 = tpu.matmul %2, %134, %cst_46 {dimension_numbers = #tpu.dot_dimension_numbers<[1], [0], [0], [1], [0, 0, 1, 1], [], []>} : vector<8x72xf32>, vector<72x256xf32>, vector<8x256xf32> -> vector<8x256xf32>
    %136 = arith.addf %135, %6 : vector<8x256xf32>
    %cst_47 = arith.constant 0.000000e+00 : f32
    %137 = vector.broadcast %cst_47 : f32 to vector<8x256xf32>
    %138 = arith.maximumf %136, %137 : vector<8x256xf32>
    %139 = vector.extract_strided_slice %138 {offsets = [0, 1], sizes = [8, 255], strides = [1, 1]} : vector<8x256xf32> to vector<8x255xf32>
    %140 = vector.extract_strided_slice %138 {offsets = [0, 0], sizes = [8, 1], strides = [1, 1]} : vector<8x256xf32> to vector<8x1xf32>
    %141 = tpu.concatenate %139, %140 in 1 : vector<8x255xf32>, vector<8x1xf32> -> vector<8x256xf32>
    %142 = arith.maximumf %138, %141 : vector<8x256xf32>
    %143 = vector.extract_strided_slice %138 {offsets = [0, 16], sizes = [8, 240], strides = [1, 1]} : vector<8x256xf32> to vector<8x240xf32>
    %144 = vector.extract_strided_slice %138 {offsets = [0, 0], sizes = [8, 16], strides = [1, 1]} : vector<8x256xf32> to vector<8x16xf32>
    %145 = tpu.concatenate %143, %144 in 1 : vector<8x240xf32>, vector<8x16xf32> -> vector<8x256xf32>
    %146 = vector.extract_strided_slice %138 {offsets = [0, 17], sizes = [8, 239], strides = [1, 1]} : vector<8x256xf32> to vector<8x239xf32>
    %147 = vector.extract_strided_slice %138 {offsets = [0, 0], sizes = [8, 17], strides = [1, 1]} : vector<8x256xf32> to vector<8x17xf32>
    %148 = tpu.concatenate %146, %147 in 1 : vector<8x239xf32>, vector<8x17xf32> -> vector<8x256xf32>
    %149 = arith.maximumf %145, %148 : vector<8x256xf32>
    %150 = arith.maximumf %142, %149 : vector<8x256xf32>
    %c0_48 = arith.constant 0 : index
    %c0_49 = arith.constant 0 : index
    %151 = vector.load %arg7[%c0_48, %c0_49] : memref<8x256xf32, #tpu.memory_space<vmem>>, vector<8x256xf32>
    tpu.vector_store %arg7[%c0_48, %c0_49], %150 {strides = array<i32>} : memref<8x256xf32, #tpu.memory_space<vmem>>, vector<8x256xf32>,
    return
  }
  func.func @transform_0(%arg0: i32) -> (i32, i32) {
    %c0_i32 = arith.constant 0 : i32
    %c0_i32_0 = arith.constant 0 : i32
    return %c0_i32, %arg0 : i32, i32
  }
  func.func @transform_1(%arg0: i32) -> (i32, i32) {
    %c0_i32 = arith.constant 0 : i32
    %c0_i32_0 = arith.constant 0 : i32
    %c0_i32_1 = arith.constant 0 : i32
    return %c0_i32, %c0_i32_0 : i32, i32
  }
  func.func @transform_2(%arg0: i32) -> (i32, i32) {
    %c0_i32 = arith.constant 0 : i32
    %c0_i32_0 = arith.constant 0 : i32
    %c0_i32_1 = arith.constant 0 : i32
    return %c0_i32, %c0_i32_0 : i32, i32
  }
  func.func @transform_3(%arg0: i32) -> (i32, i32) {
    %c0_i32 = arith.constant 0 : i32
    %c0_i32_0 = arith.constant 0 : i32
    %c0_i32_1 = arith.constant 0 : i32
    return %c0_i32, %c0_i32_0 : i32, i32
  }
  func.func @transform_4(%arg0: i32) -> (i32, i32) {
    %c0_i32 = arith.constant 0 : i32
    %c0_i32_0 = arith.constant 0 : i32
    %c0_i32_1 = arith.constant 0 : i32
    return %c0_i32, %c0_i32_0 : i32, i32
  }
  func.func @transform_5(%arg0: i32) -> (i32, i32) {
    %c0_i32 = arith.constant 0 : i32
    %c0_i32_0 = arith.constant 0 : i32
    %c0_i32_1 = arith.constant 0 : i32
    return %c0_i32, %c0_i32_0 : i32, i32
  }
  func.func @transform_6(%arg0: i32) -> (i32, i32) {
    %c0_i32 = arith.constant 0 : i32
    %c0_i32_0 = arith.constant 0 : i32
    return %c0_i32, %arg0 : i32, i32
  }
}

</mosaic_0001>

<bundles_post_ra>
// kernel: rcl_block_forward.1
= control target key start
LH: loop header
LB: loop body
LE: loop exit
PB: predicated region body
PF: predicated region fallthrough
CT: control target
= control target key end

     0   :  { %s1044_s21 = smov 0   ;;  %s1305_s0 = inlined_call_operand.vmem [shape: f32[8,512], index: 0, kind: input, shape index: {}]   ;;  %s1306_s1 = inlined_call_operand.vmem [shape: f32[8,8], index: 1, kind: input, shape index: {}]   ;;  %s1307_s2 = inlined_call_operand.vmem [shape: f32[8,1], index: 2, kind: input, shape index: {}]   ;;  %s1308_s3 = inlined_call_operand.vmem [shape: f32[8,72], index: 3, kind: input, shape index: {}]   ;;  %s1309_s4 = inlined_call_operand.vmem [shape: f32[8,1], index: 4, kind: input, shape index: {}]   ;;  %s1310_s5 = inlined_call_operand.vmem [shape: f32[9,256], index: 5, kind: input, shape index: {}]   ;;  %s1311_s6 = inlined_call_operand.vmem [shape: f32[8,512], index: 6, kind: output, shape index: {}]  }
   0x1 LB: > { %s923_s22 = sadd.s32 4294967295, %s997_s21   ;;  %p927_p0 = scmp.ge.s32.totalorder %s997_s21, 1  ;;  %s997_s21 = sphi %s1044_s21, %s16_s21  }
   0x2   : > { %p213_p1 = scmp.lt.s32.totalorder %s997_s21, 3 }
   0x4   : > { %p214_p2 = pnand %p927_p0, %p213_p1 }
   0x5   : > { %s928_s23 = sshll.u32 (!%p214_p2), %s923_s22, 1  ;;  %v269_v0 = vld [vmem:[%s1307_s2] sm:$0xff] (!%p214_p2)  ;;  %v999_v1 = vmov (!%p214_p2), 0.0   ;;  %v1000_v2 = vmov (!%p214_p2), 0   ;;  %vm275_vm0 = vcmask (!%p214_p2), 64512   ;;  %s1001_s8 = smov (!%p214_p2), 16   ;;  %v366_v16 = vlaneseq (!%p214_p2) }
   0x6   : > { %217 = sbr.rel (%p214_p2) target bundleno = 1101 (0x44d), region = 44  ;;  %p244_p3 = scmp.lt.s32.totalorder (!%p214_p2), %s928_s23, 3  ;;  %343 = vmatprep.mubr.f32.mxu0 (!%p214_p2), %v999_v1  ;;  %989 = vset.pattern.permute.xlu0 (!%p214_p2), %v1000_v2  ;;  %v257_v5 = vld [vmem:[%s1306_s1] sm:$0xff] (!%p214_p2)  ;;  %v260_v25 = vld [vmem:[%s1310_s5 + $0x8] sm:$0xff] (!%p214_p2)  ;;  %vm383_vm1 = vcmask (!%p214_p2), 130048   ;;  %vm361_vm2 = vcmask (!%p214_p2), 138240  }
   0x7   : > { %272 = vperm.xlu0 (!%p214_p2), %989, %v269_v0   ;;  %620 = vmatprep.mubr.f32.mxu1 (!%p214_p2), %v999_v1  ;;  %s1002_s9 = smov (!%p214_p2), 17   ;;  %s1003_s10 = smov (!%p214_p2), 15   ;;  %v263_v15 = vld [vmem:[%s1309_s4] sm:$0xff] (!%p214_p2)  ;;  %v1113_v19 = vshrl.u32 (!%p214_p2), %v366_v16, 7  ;;  %vm405_vm3 = vcmask (!%p214_p2), 121856   ;;  %vm450_vm4 = vcmask (!%p214_p2), 1039360  }
   0x8   : > { %990 = vset.pattern.permute.xlu1 (!%p214_p2), %v1000_v2  ;;  %s1004_s11 = smov (!%p214_p2), 127   ;;  %s1005_s12 = smov (!%p214_p2), 1   ;;  %v1119_v23 = vld [vmem:[%s1310_s5] sm:$0xff] (!%p214_p2)  ;;  %vm427_vm5 = vcmask (!%p214_p2), 7168   ;;  %vm472_vm6 = vcmask (!%p214_p2), 924672   ;;  %vm494_vm7 = vcmask (!%p214_p2), 916480  }
   0x9   : > { %s1006_s13 = smov (!%p214_p2), 113   ;;  %s1007_s14 = smov (!%p214_p2), 112   ;;  %v390_v22 = vsub.s32 (!%p214_p2), 1, %v1113_v19  ;;  %v368_v24 = vsub.s32 (!%p214_p2), 0, %v1113_v19  ;;  %v412_v26 = vsub.s32 (!%p214_p2), 2, %v1113_v19  ;;  %v458_v29 = vsub.s32 (!%p214_p2), 5, %v1113_v19 }
   0xa   : > { %s1008_s15 = smov (!%p214_p2), 111   ;;  %v434_v30 = vsub.s32 (!%p214_p2), 3, %v1113_v19  ;;  %v480_v53 = vsub.s32 (!%p214_p2), 6, %v1113_v19  ;;  %v502_v59 = vsub.s32 (!%p214_p2), 7, %v1113_v19  ;;  %vm516_vm8 = vcmask (!%p214_p2), 908288  }
   0xb   : > { %v1129_v31 = vrot.slane (!%p214_p2), %v1119_v23, %v390_v22  ;;  %v1131_v32 = vrot.slane (!%p214_p2), %v260_v25, %v390_v22  ;;  %v1135_v34 = vrot.slane (!%p214_p2), %v1119_v23, %v368_v24  ;;  %v1137_v35 = vrot.slane (!%p214_p2), %v260_v25, %v368_v24 }
   0xc   : > { %v1141_v37 = vrot.slane (!%p214_p2), %v1119_v23, %v412_v26  ;;  %v1143_v38 = vrot.slane (!%p214_p2), %v260_v25, %v412_v26  ;;  %v1145_v41 = vrot.slane (!%p214_p2), %v260_v25, %v458_v29  ;;  %v1148_v42 = vrot.slane (!%p214_p2), %v1119_v23, %v434_v30 }
   0xd   : > { %s1313_s23 = smov (!%p244_p3, %s928_s23), 3  ;;  %v1150_v43 = vrot.slane %v260_v25, %v434_v30  ;;  %v1161_v52 = vrot.slane %v1119_v23, %v458_v29  ;;  %v1182_v16 = vrot.slane %v1119_v23, %v502_v59  ;;  %vm552_vm9 = vcmask 588800  }
   0xe   : > { %s929_s26 = sshll.u32 %s1313_s23, 3 }
   0xf   : > { %s247_s29 = scalar_lea.vmem %s1305_s0, %s929_s26 }
  0x10   : > { %v1063_v3 = vld [vmem:[%s247_s29 + $0x8] sm:$0xff]  ;;  %v1065_v4 = vld [vmem:[%s247_s29] sm:$0xff] }
  0x11   : > { %279 = vmatprep.subr.mxu0 %v1063_v3 }
  0x12   : > { %280 = vmatpush1.msra.mxu0 %v1065_v4 }
  0x13   : > { %932 = vmatmul.mubr.msk.f32.vlgmr.msra.gmra.mrb[0].mxu0 %vm275_vm0, %v257_v5 }
  0x14   : > { %821 = vmatprep.mubr.f32.mxu0 %v999_v1 }
  0x86   : > { %v273_v6 = vpop.permute.xlu0 %272 }
  0xe6   : > { %v345_v7 = vpop.f32.mrb[0].mxu0 }
  0xe7   : > { %v346_v8 = vadd.f32 %v345_v7, %v273_v6  ;;  %v347_v9 = vpop.f32.mrb[1].mxu0 }
  0xe8   : > { %v348_v12 = vadd.f32 %v347_v9, %v273_v6 }
  0xe9   : > { %v350_v10 = vmax.f32 %v346_v8, 0.0 }
  0xea   : > { %v351_v13 = vmax.f32 %v348_v12, 0.0  ;;  %v1176_v12 = vrot.slane %v1119_v23, %v480_v53 }
  0xeb   : > { %v1073_v11 = vadd.f32 %v350_v10, %v1065_v4 }
  0xec   : > { %v1084_v14 = vadd.f32 %v351_v13, %v1063_v3  ;;  %v1178_v13 = vrot.slane %v260_v25, %v480_v53 }
  0xed   : > { %381 = vrot.lane.b32.xlu0 %v1073_v11, %s1001_s8  ;;  %359 = vrot.lane.b32.xlu1 %v1073_v11, %s1002_s9 }
  0xf1   : > { %403 = vrot.lane.b32.xlu0 %v1073_v11, %s1003_s10  ;;  %446 = vrot.lane.b32.xlu1 %v1073_v11, %s1004_s11 }
  0xf5   : > { %425 = vrot.lane.b32.xlu0 %v1073_v11, %s1005_s12  ;;  %378 = vrot.lane.b32.xlu1 %v1084_v14, %s1001_s8 }
  0xf9   : > { %355 = vrot.lane.b32.xlu0 %v1084_v14, %s1002_s9  ;;  %400 = vrot.lane.b32.xlu1 %v1084_v14, %s1003_s10 }
  0xfd   : > { %448 = vrot.lane.b32.xlu0 %v1084_v14, %s1004_s11  ;;  %422 = vrot.lane.b32.xlu1 %v1084_v14, %s1005_s12 }
 0x101   : > { %470 = vrot.lane.b32.xlu0 %v1084_v14, %s1006_s13  ;;  %468 = vrot.lane.b32.xlu1 %v1073_v11, %s1006_s13 }
 0x105   : > { %492 = vrot.lane.b32.xlu0 %v1084_v14, %s1007_s14  ;;  %490 = vrot.lane.b32.xlu1 %v1073_v11, %s1007_s14 }
 0x109   : > { %514 = vrot.lane.b32.xlu0 %v1084_v14, %s1008_s15  ;;  %512 = vrot.lane.b32.xlu1 %v1073_v11, %s1008_s15 }
 0x10d   : > { %266 = vperm.xlu1 %990, %v263_v15  }
 0x15f   : > { %v382_v17 = vpop.permute.xlu0 %381  ;;  %v360_v18 = vpop.permute.xlu1 %359 }
 0x163   : > { %v404_v20 = vpop.permute.xlu0 %403  ;;  %v447_v21 = vpop.permute.xlu1 %446 }
 0x167   : > { %v426_v27 = vpop.permute.xlu0 %425  ;;  %v379_v28 = vpop.permute.xlu1 %378 }
 0x168   : > { %v387_v33 = vsel %vm383_vm1, %v379_v28, %v382_v17  ;;  %v384_v36 = vsel %vm383_vm1, %v382_v17, %v379_v28  ;;  %v1184_v17 = vrot.slane %v260_v25, %v502_v59  ;;  %v1198_v28 = vld [vmem:[%s1310_s5 + $0x18] ss:$0 sm:$0xff] }
 0x169   : > { %v396_v44 = vmul.f32 %v1129_v31, %v387_v33  ;;  %v397_v51 = vmul.f32 %v1131_v32, %v384_v36 }
 0x16b   : > { %v356_v39 = vpop.permute.xlu0 %355  ;;  %v401_v40 = vpop.permute.xlu1 %400 }
 0x16c   : > { %v362_v45 = vsel %vm361_vm2, %v360_v18, %v356_v39  ;;  %v365_v46 = vsel %vm361_vm2, %v356_v39, %v360_v18  ;;  %v409_v47 = vsel %vm405_vm3, %v401_v40, %v404_v20  ;;  %v406_v49 = vsel %vm405_vm3, %v404_v20, %v401_v40  ;;  %v1204_v39 = vld [vmem:[%s1310_s5 + $0x10] ss:$0 sm:$0xff] }
 0x16d   : > { %v374_v48 = vmul.f32 %v1135_v34, %v365_v46  ;;  %v375_v50 = vmul.f32 %v1137_v35, %v362_v45  ;;  %v418_v54 = vmul.f32 %v1141_v37, %v409_v47  ;;  %v419_v60 = vmul.f32 %v1143_v38, %v406_v49  ;;  %v1212_v46 = vld [vmem:[%s1308_s3] sm:$0xff] }
 0x16f   : > { %v449_v55 = vpop.permute.xlu0 %448  ;;  %v423_v56 = vpop.permute.xlu1 %422  ;;  %v939_v57 = vpack.c.bf16 %v397_v51, %v375_v50  ;;  %v941_v58 = vpack.c.bf16 %v396_v44, %v374_v48 }
 0x170   : > { %v455_v61 = vsel %vm450_vm4, %v449_v55, %v447_v21  ;;  %v428_v62 = vsel %vm427_vm5, %v426_v27, %v423_v56  ;;  %v431_v63 = vsel %vm427_vm5, %v423_v56, %v426_v27  ;;  %v451_v0 = vsel %vm450_vm4, %v447_v21, %v449_v55 }
 0x171   : > { %v465_v1 = vmul.f32 %v1145_v41, %v455_v61  ;;  %v440_v2 = vmul.f32 %v1148_v42, %v431_v63  ;;  %v441_v5 = vmul.f32 %v1150_v43, %v428_v62  ;;  %940 = vmatprep.subr.bf16.mxu1 %v939_v57  ;;  %v464_v10 = vmul.f32 %v1161_v52, %v451_v0 }
 0x172   : > { %942 = vmatpush1.bf16.msra.mxu1 %v941_v58 }
 0x173   : > { %v471_v6 = vpop.permute.xlu0 %470  ;;  %v469_v7 = vpop.permute.xlu1 %468  ;;  %v943_v8 = vpack.c.bf16 %v441_v5, %v419_v60  ;;  %v945_v9 = vpack.c.bf16 %v440_v2, %v418_v54  ;;  %v947_v15 = vpack.c.bf16 %v465_v1, %v1084_v14  ;;  %v949_v14 = vpack.c.bf16 %v464_v10, %v1073_v11 }
 0x174   : > { %v473_v18 = vsel %vm472_vm6, %v469_v7, %v471_v6  ;;  %v477_v19 = vsel %vm472_vm6, %v471_v6, %v469_v7 }
 0x175   : > { %944 = vmatprep.subr.bf16.mxu1 %v943_v8  ;;  %v486_v23 = vmul.f32 %v1176_v12, %v473_v18  ;;  %v487_v25 = vmul.f32 %v1178_v13, %v477_v19 }
 0x176   : > { %946 = vmatpush1.bf16.msra.mxu1 %v945_v9 }
 0x177   : > { %v493_v20 = vpop.permute.xlu0 %492  ;;  %948 = vmatprep.subr.bf16.mxu1 %v947_v15  ;;  %v491_v21 = vpop.permute.xlu1 %490 }
 0x178   : > { %v495_v22 = vsel %vm494_vm7, %v491_v21, %v493_v20  ;;  %v499_v24 = vsel %vm494_vm7, %v493_v20, %v491_v21 }
 0x179   : > { %v508_v26 = vmul.f32 %v1182_v16, %v495_v22  ;;  %v509_v27 = vmul.f32 %v1184_v17, %v499_v24 }
 0x17a   : > { %950 = vmatpush1.bf16.msra.mxu1 %v949_v14 }
 0x17b   : > { %v515_v29 = vpop.permute.xlu0 %514  ;;  %v513_v30 = vpop.permute.xlu1 %512  ;;  %v951_v33 = vpack.c.bf16 %v509_v27, %v487_v25  ;;  %v953_v36 = vpack.c.bf16 %v508_v26, %v486_v23 }
 0x17c   : > { %v521_v11 = vsel %vm516_vm8, %v515_v29, %v513_v30  ;;  %v517_v40 = vsel %vm516_vm8, %v513_v30, %v515_v29 }
 0x17d   : > { %v531_v44 = vmul.f32 %v1198_v28, %v521_v11  ;;  %952 = vmatprep.subr.bf16.mxu1 %v951_v33  ;;  %v530_v45 = vmul.f32 %v1204_v39, %v517_v40 }
 0x17e   : > { %954 = vmatpush1.bf16.msra.mxu1 %v953_v36 }
 0x17f   : > { %572 = vmatprep.subr.mxu1 %v531_v44 }
 0x182   : > { %573 = vmatpush1.msra.mxu1 %v530_v45 }
 0x183   : > { %935 = vmatmul.mubr.msk.f32.vlgmr.msra.gmra.mrb[0].mxu1 %vm552_vm9, %v1212_v46 }
 0x18c   : > { %v1216_v47 = vpop.permute.xlu1 %266 }
 0x256   : > { %v622_v48 = vpop.f32.mrb[0].mxu1 }
 0x257   : > { %v623_v49 = vadd.f32 %v622_v48, %v1216_v47  ;;  %v624_v50 = vpop.f32.mrb[1].mxu1 }
 0x258   : > { %v625_v51 = vadd.f32 %v624_v50, %v1216_v47 }
 0x259   : > { %v627_v53 = vmax.f32 %v623_v49, 0.0 }
 0x25a   : > { %v628_v55 = vmax.f32 %v625_v51, 0.0 }
 0x25b   : > { %v1221_v54 = vadd.f32 %v627_v53, %v1065_v4 }
 0x25c   : > { %v630_v56 = vadd.f32 %v628_v55, %v1063_v3 }
 0x25d   : > { %687 = vrot.lane.b32.xlu0 %v1221_v54, %s1004_s11  ;;  %636 = vrot.lane.b32.xlu1 %v1221_v54, %s1002_s9 }
 0x261   : > { %632 = vrot.lane.b32.xlu0 %v630_v56, %s1002_s9  ;;  %649 = vrot.lane.b32.xlu1 %v1221_v54, %s1001_s8  ;;  %s253_s9 = scalar_lea.vmem %s1311_s6, %s929_s26 }
 0x265   : > { %646 = vrot.lane.b32.xlu0 %v630_v56, %s1001_s8  ;;  %662 = vrot.lane.b32.xlu1 %v1221_v54, %s1003_s10 }
 0x269   : > { %659 = vrot.lane.b32.xlu0 %v630_v56, %s1003_s10  ;;  %675 = vrot.lane.b32.xlu1 %v1221_v54, %s1005_s12 }
 0x26d   : > { %672 = vrot.lane.b32.xlu0 %v630_v56, %s1005_s12  ;;  %689 = vrot.lane.b32.xlu1 %v630_v56, %s1004_s11 }
 0x271   : > { %700 = vrot.lane.b32.xlu0 %v1221_v54, %s1006_s13  ;;  %702 = vrot.lane.b32.xlu1 %v630_v56, %s1006_s13 }
 0x275   : > { %713 = vrot.lane.b32.xlu0 %v1221_v54, %s1007_s14  ;;  %715 = vrot.lane.b32.xlu1 %v630_v56, %s1007_s14 }
 0x279   : > { %726 = vrot.lane.b32.xlu0 %v1221_v54, %s1008_s15  ;;  %728 = vrot.lane.b32.xlu1 %v630_v56, %s1008_s15 }
 0x2cf   : > { %v688_v3 = vpop.permute.xlu0 %687  ;;  %v637_v4 = vpop.permute.xlu1 %636 }
 0x2d3   : > { %v633_v57 = vpop.permute.xlu0 %632  ;;  %v650_v58 = vpop.permute.xlu1 %649 }
 0x2d4   : > { %v638_v59 = vsel %vm361_vm2, %v637_v4, %v633_v57  ;;  %v641_v60 = vsel %vm361_vm2, %v633_v57, %v637_v4 }
 0x2d5   : > { %v642_v1 = vmul.f32 %v641_v60, %v1135_v34  ;;  %v643_v2 = vmul.f32 %v638_v59, %v1137_v35 }
 0x2d7   : > { %v647_v61 = vpop.permute.xlu0 %646  ;;  %v663_v62 = vpop.permute.xlu1 %662 }
 0x2d8   : > { %v651_v63 = vsel %vm383_vm1, %v650_v58, %v647_v61  ;;  %v654_v0 = vsel %vm383_vm1, %v647_v61, %v650_v58 }
 0x2d9   : > { %v655_v5 = vmul.f32 %v654_v0, %v1129_v31  ;;  %v656_v6 = vmul.f32 %v651_v63, %v1131_v32 }
 0x2db   : > { %v957_v7 = vpack.c.bf16 %v655_v5, %v642_v1  ;;  %v660_v8 = vpop.permute.xlu0 %659  ;;  %v676_v9 = vpop.permute.xlu1 %675  ;;  %v955_v10 = vpack.c.bf16 %v656_v6, %v643_v2 }
 0x2dc   : > { %v667_v15 = vsel %vm405_vm3, %v660_v8, %v663_v62  ;;  %v664_v18 = vsel %vm405_vm3, %v663_v62, %v660_v8 }
 0x2dd   : > { %956 = vmatprep.subr.bf16.mxu0 %v955_v10  ;;  %v668_v19 = vmul.f32 %v667_v15, %v1141_v37  ;;  %v669_v35 = vmul.f32 %v664_v18, %v1143_v38 }
 0x2de   : > { %958 = vmatpush1.bf16.msra.mxu0 %v957_v7 }
 0x2df   : > { %v673_v20 = vpop.permute.xlu0 %672  ;;  %v690_v34 = vpop.permute.xlu1 %689 }
 0x2e0   : > { %v677_v31 = vsel %vm427_vm5, %v676_v9, %v673_v20  ;;  %v680_v32 = vsel %vm427_vm5, %v673_v20, %v676_v9  ;;  %v695_v21 = vsel %vm450_vm4, %v690_v34, %v688_v3  ;;  %v691_v14 = vsel %vm450_vm4, %v688_v3, %v690_v34 }
 0x2e1   : > { %v681_v22 = vmul.f32 %v680_v32, %v1148_v42  ;;  %v682_v24 = vmul.f32 %v677_v31, %v1150_v43  ;;  %v697_v23 = vmul.f32 %v695_v21, %v1145_v41  ;;  %v696_v38 = vmul.f32 %v691_v14, %v1161_v52 }
 0x2e3   : > { %v961_v25 = vpack.c.bf16 %v681_v22, %v668_v19  ;;  %v701_v37 = vpop.permute.xlu0 %700  ;;  %v703_v26 = vpop.permute.xlu1 %702  ;;  %v959_v27 = vpack.c.bf16 %v682_v24, %v669_v35  ;;  %v963_v29 = vpack.c.bf16 %v697_v23, %v630_v56  ;;  %v965_v36 = vpack.c.bf16 %v696_v38, %v1221_v54 }
 0x2e4   : > { %v704_v30 = vsel %vm472_vm6, %v701_v37, %v703_v26  ;;  %v708_v33 = vsel %vm472_vm6, %v703_v26, %v701_v37 }
 0x2e5   : > { %960 = vmatprep.subr.bf16.mxu0 %v959_v27  ;;  %v709_v40 = vmul.f32 %v704_v30, %v1176_v12  ;;  %v710_v52 = vmul.f32 %v708_v33, %v1178_v13 }
 0x2e6   : > { %962 = vmatpush1.bf16.msra.mxu0 %v961_v25 }
 0x2e7   : > { %v714_v42 = vpop.permute.xlu0 %713  ;;  %964 = vmatprep.subr.bf16.mxu0 %v963_v29  ;;  %v716_v43 = vpop.permute.xlu1 %715 }
 0x2e8   : > { %v717_v41 = vsel %vm494_vm7, %v714_v42, %v716_v43  ;;  %v721_v11 = vsel %vm494_vm7, %v716_v43, %v714_v42 }
 0x2e9   : > { %v722_v44 = vmul.f32 %v717_v41, %v1182_v16  ;;  %v723_v45 = vmul.f32 %v721_v11, %v1184_v17 }
 0x2ea   : > { %966 = vmatpush1.bf16.msra.mxu0 %v965_v36 }
 0x2eb   : > { %v969_v48 = vpack.c.bf16 %v722_v44, %v709_v40  ;;  %v727_v49 = vpop.permute.xlu0 %726  ;;  %v729_v50 = vpop.permute.xlu1 %728  ;;  %v967_v51 = vpack.c.bf16 %v723_v45, %v710_v52 }
 0x2ec   : > { %v734_v53 = vsel %vm516_vm8, %v729_v50, %v727_v49  ;;  %v730_v54 = vsel %vm516_vm8, %v727_v49, %v729_v50 }
 0x2ed   : > { %v736_v55 = vmul.f32 %v1198_v28, %v734_v53  ;;  %968 = vmatprep.subr.bf16.mxu0 %v967_v51  ;;  %v735_v12 = vmul.f32 %v1204_v39, %v730_v54 }
 0x2ee   : > { %970 = vmatpush1.bf16.msra.mxu0 %v969_v48 }
 0x2ef   : > { %773 = vmatprep.subr.mxu0 %v736_v55 }
 0x2f2   : > { %774 = vmatpush1.msra.mxu0 %v735_v12 }
 0x2f3   : > { %936 = vmatmul.mubr.msk.f32.vlgmr.msra.gmra.mrb[2].mxu0 %vm552_vm9, %v1212_v46 }
 0x3c6   : > { %v823_v13 = vpop.f32.mrb[2].mxu0 }
 0x3c7   : > { %v824_v16 = vadd.f32 %v823_v13, %v1216_v47  ;;  %v825_v17 = vpop.f32.mrb[3].mxu0 }
 0x3c8   : > { %v826_v56 = vadd.f32 %v825_v17, %v1216_v47 }
 0x3c9   : > { %v828_v3 = vmax.f32 %v824_v16, 0.0 }
 0x3ca   : > { %v829_v4 = vmax.f32 %v826_v56, 0.0 }
 0x3cb   : > { %832 = vrot.lane.b32.xlu0 %v828_v3, %s1004_s11 }
 0x3cc   : > { %834 = vrot.lane.b32.xlu1 %v829_v4, %s1004_s11 }
 0x3cf   : > { %843 = vrot.lane.b32.xlu0 %v828_v3, %s1007_s14 }
 0x3d0   : > { %845 = vrot.lane.b32.xlu1 %v829_v4, %s1007_s14 }
 0x3d3   : > { %852 = vrot.lane.b32.xlu0 %v828_v3, %s1008_s15 }
 0x3d4   : > { %854 = vrot.lane.b32.xlu1 %v829_v4, %s1008_s15 }
 0x43d   : > { %v833_v28 = vpop.permute.xlu0 %832 }
 0x43e   : > { %v835_v39 = vpop.permute.xlu1 %834 }
 0x43f   : > { %v836_v47 = vsel %vm450_vm4, %v833_v28, %v835_v39  ;;  %v840_v58 = vsel %vm450_vm4, %v835_v39, %v833_v28 }
 0x440   : > { %v841_v1 = vmax.f32 %v828_v3, %v836_v47  ;;  %v842_v2 = vmax.f32 %v829_v4, %v840_v58 }
 0x441   : > { %v844_v46 = vpop.permute.xlu0 %843 }
 0x442   : > { %v846_v57 = vpop.permute.xlu1 %845 }
 0x443   : > { %v847_v61 = vsel %vm494_vm7, %v844_v46, %v846_v57  ;;  %v851_v62 = vsel %vm494_vm7, %v846_v57, %v844_v46 }
 0x445   : > { %v853_v59 = vpop.permute.xlu0 %852 }
 0x446   : > { %v855_v60 = vpop.permute.xlu1 %854 }
 0x447   : > { %v856_v63 = vsel %vm516_vm8, %v853_v59, %v855_v60  ;;  %v860_v0 = vsel %vm516_vm8, %v855_v60, %v853_v59 }
 0x448   : > { %v861_v5 = vmax.f32 %v847_v61, %v856_v63  ;;  %v862_v6 = vmax.f32 %v851_v62, %v860_v0 }
 0x44a   : > { %v863_v7 = vmax.f32 %v841_v1, %v861_v5  ;;  %v864_v8 = vmax.f32 %v842_v2, %v862_v6 }
 0x44c   : > { %865 = vst [vmem:[%s253_s9] sm:$0xff] %v863_v7  ;;  %866 = vst [vmem:[%s253_s9 + $0x8] sm:$0xff] %v864_v8 }
 0x44d PF: > { %s16_s21 = sadd.s32 1, %s997_s21  }
 0x44e   : > { %p13_p4 = scmp.ge.s32.totalorder %s16_s21, 4  }
 0x450   :  { %15 = sbr.rel (!%p13_p4) target bundleno = 1 (0x1), region = 74 }

</bundles_post_ra>
